<compile_context>
chip_gen: v7x
topology: tpu7x:2x2x1
jax: 0.10.0
libtpu: 0.0.40
codegen_flags: <defaults>
</compile_context>

<pallas_src>
import functools

import jax
import jax.numpy as jnp
from jax.experimental import pallas as pl
from jax.experimental.pallas import tpu as pltpu


EPS = 1e-5


def _rmsnorm_kernel(x_ref, o_ref, *, inv_hidden):
    # x_ref: (tile_rows, hidden) in VMEM.
    # f32 compute path (mandatory on v5e, numerically better everywhere);
    # the cast cost hides under DMA for this memory-bound kernel.
    x = x_ref[...].astype(jnp.float32)
    # Fold 1/hidden of the mean into a constant multiply; the row reduction
    # goes to the XLU and rsqrt to the EUP -> both off the VPU critical path.
    ms = jnp.sum(x * x, axis=-1, keepdims=True) * inv_hidden
    inv = jax.lax.rsqrt(ms + EPS)
    o_ref[...] = (x * inv).astype(o_ref.dtype)


def _round_up(n, m):
    return ((n + m - 1) // m) * m


def rmsnorm(x):
    """RMSNorm over the last axis of x (any leading dims)."""
    orig_shape = x.shape
    hidden = orig_shape[-1]
    rows = 1
    for d in orig_shape[:-1]:
        rows *= d
    x2d = x.reshape(rows, hidden)

    # --- row-tile sizing --------------------------------------------------
    # Sublane packing: bf16 packs 16 rows per vreg, f32 packs 8.
    sublane = 16 if jnp.dtype(x.dtype).itemsize == 2 else 8
    # Aim for ~2 MiB per (f32-equivalent) input tile: big enough to amortize
    # the ~0.35 us per-grid-step overhead, small enough that double-buffered
    # in+out tiles stay far below v7x's 64 MiB physical VMEM.
    target_tile_bytes = 2 * 1024 * 1024
    tile_r = max(sublane,
                 (target_tile_bytes // (hidden * 4)) // sublane * sublane)
    tile_r = min(tile_r, 1024)                       # keep per-step overhead amortized
    tile_r = min(tile_r, _round_up(rows, sublane))   # don't exceed the array
    grid = (pl.cdiv(rows, tile_r),)

    # VMEM budget: 2x double-buffered input + output tiles plus headroom;
    # capped at 48 MiB so it still fits v7x (64 MiB physical VMEM).
    itemsize = jnp.dtype(x.dtype).itemsize
    tile_bytes = tile_r * hidden * max(4, itemsize)
    vmem_limit = int(min(max(8 * tile_bytes, 16 * 1024 * 1024),
                         48 * 1024 * 1024))

    kernel = functools.partial(_rmsnorm_kernel, inv_hidden=1.0 / hidden)

    # NOTE: the hidden axis is never tiled (full last-dim extent), so the
    # per-row mean is always complete; partial row blocks at the tail are
    # handled by Pallas block padding + masked writeback (safe for a
    # per-row op — padded rows never contaminate valid rows).
    out = pl.pallas_call(
        kernel,
        out_shape=jax.ShapeDtypeStruct((rows, hidden), x.dtype),
        grid=grid,
        in_specs=[pl.BlockSpec((tile_r, hidden), lambda i: (i, 0))],
        out_specs=pl.BlockSpec((tile_r, hidden), lambda i: (i, 0)),
        compiler_params=pltpu.CompilerParams(
            dimension_semantics=("parallel",),
            vmem_limit_bytes=vmem_limit,
        ),
        cost_estimate=pl.CostEstimate(
            flops=3 * rows * hidden,          # square + reduce + scale
            transcendentals=rows,             # one rsqrt per row
            bytes_accessed=2 * rows * hidden * itemsize,
        ),
    )(x2d)
    return out.reshape(orig_shape)


def rmsnorm_ref(x):
    xf = x.astype(jnp.float32)
    ms = jnp.mean(xf * xf, axis=-1, keepdims=True)
    return (xf * jax.lax.rsqrt(ms + EPS)).astype(x.dtype)


if __name__ == "__main__":
    key = jax.random.PRNGKey(0)
    # (batch=2, seq=8, hidden=32)
    x = jax.random.normal(key, (2, 8, 32), dtype=jnp.float32)

    out = rmsnorm(x)
    out = jax.block_until_ready(out)

    ref = rmsnorm_ref(x)
    assert out.shape == x.shape and out.dtype == x.dtype
    assert jnp.allclose(out, ref, atol=1e-5, rtol=1e-5)
    print("KERNEL_OK")
</pallas_src>

<mosaic_0001>
module attributes {stable_mosaic.version = 11 : i64} {
  func.func @_rmsnorm_kernel(%arg0: i32, %arg1: memref<16x32xf32, #tpu.memory_space<vmem>>, %arg2: memref<16x32xf32, #tpu.memory_space<vmem>>) attributes {dimension_semantics = [#tpu.dimension_semantics<parallel>], iteration_bounds = array<i64: 1>, scalar_prefetch = 0 : i64, scratch_operands = 0 : i64, tpu.core_type = #tpu.core_type<tc>, window_params = [{transform_indices = @transform_0, window_bounds = array<i64: 16, 32>}, {transform_indices = @transform_1, window_bounds = array<i64: 16, 32>}]} {
    %c0 = arith.constant 0 : index
    %c0_0 = arith.constant 0 : index
    %0 = vector.load %arg1[%c0, %c0_0] : memref<16x32xf32, #tpu.memory_space<vmem>>, vector<16x32xf32>
    %1 = arith.mulf %0, %0 : vector<16x32xf32>
    %cst = arith.constant dense<0.000000e+00> : vector<16xf32>
    %2 = vector.multi_reduction <add>, %1, %cst [1] : vector<16x32xf32> to vector<16xf32>
    %3 = vector.shape_cast %2 : vector<16xf32> to vector<16x1xf32>
    %cst_1 = arith.constant 3.125000e-02 : f32
    %4 = vector.broadcast %cst_1 : f32 to vector<16x1xf32>
    %5 = arith.mulf %3, %4 : vector<16x1xf32>
    %cst_2 = arith.constant 9.99999974E-6 : f32
    %6 = vector.broadcast %cst_2 : f32 to vector<16x1xf32>
    %7 = arith.addf %5, %6 : vector<16x1xf32>
    %8 = math.rsqrt %7 : vector<16x1xf32>
    %9 = vector.broadcast %8 : vector<16x1xf32> to vector<16x32xf32>
    %10 = arith.mulf %0, %9 : vector<16x32xf32>
    %c0_3 = arith.constant 0 : index
    %c0_4 = arith.constant 0 : index
    %11 = vector.load %arg2[%c0_3, %c0_4] : memref<16x32xf32, #tpu.memory_space<vmem>>, vector<16x32xf32>
    tpu.vector_store %arg2[%c0_3, %c0_4], %10 {strides = array<i32>} : memref<16x32xf32, #tpu.memory_space<vmem>>, vector<16x32xf32>,
    return
  }
  func.func @transform_0(%arg0: i32) -> (i32, i32) {
    %c0_i32 = arith.constant 0 : i32
    %c0_i32_0 = arith.constant 0 : i32
    return %arg0, %c0_i32 : i32, i32
  }
  func.func @transform_1(%arg0: i32) -> (i32, i32) {
    %c0_i32 = arith.constant 0 : i32
    %c0_i32_0 = arith.constant 0 : i32
    return %arg0, %c0_i32 : i32, i32
  }
}

</mosaic_0001>

<bundles_post_ra>
// kernel: tpu_custom_call.1
= control target key start
LH: loop header
LB: loop body
LE: loop exit
PB: predicated region body
PF: predicated region fallthrough
CT: control target
= control target key end

     0   :  { %6 = vsyncpa [#allocation3], 0  ;;  %s165_s0 = inlined_call_operand.hbm [shape: f32[16,32], index: 0, kind: input, shape index: {}]   ;;  %s166_s1 = inlined_call_operand.hbm [shape: f32[16,32], index: 1, kind: output, shape index: {}]  }
   0x1   :  { %7 = vsyncpa [#allocation4], 0  ;;  %s117_s6 = smov [#allocation2]   ;;  %s69_s10 = scalar_lea.hbm %s165_s0, 256 }
   0x2   :  { %s13_s7 = sshll.u32 %s117_s6, 4  ;;  %p70_p0 = scmp.ne.s32.totalorder %s165_s0, %s69_s10  ;;  %s14_s7 = int_to_ptr.vmem [resolvable:$true] %s13_s7 }
   0x3   :  { %p73_p1 = scmp.lt.u32.totalorder %s69_s10, %s165_s0 }
   0x5   :  { %p75_p2 = pnand %p73_p1, %p70_p0 }
   0x7   :  { %78 = shalt.err (!%p75_p2)
}
   0x8   :  { %s79_s15 = scalar_lea.vmem %s14_s7, 256  ;;  %p84_p4 = scmp.lt.s32.totalorder %s14_s7, %s14_s7 }
   0x9   :  { %p80_p3 = scmp.ne.s32.totalorder %s14_s7, %s79_s15  ;;  %p85_p5 = scmp.lt.s32.totalorder %s79_s15, %s79_s15 }
   0xb   :  { %p86_p6 = por %p85_p5, %p84_p4 }
   0xd   :  { %p87_p7 = pnand %p86_p6, %p80_p3 }
   0xf   :  { %90 = shalt.err (!%p87_p7)
}
  0x10   :  { %s118_s16 = smov 128   ;;  %s119_s17 = smov 8  }
  0x11   :  { %19 = dma.hbm_to_vmem [thread:$0]  %s165_s0, 256, %s14_s7, [#allocation3], %s118_s16, %s118_s16, %s119_s17  }
  0x12   :  { %113 = dma.done.wait [#allocation3], 256  }
  0x13   :  { %114 = vsyncadd [#allocation3], 4294967040  ;;  %v23_v0 = vld [vmem:[#allocation2] sm:$0xff]  ;;  %vm27_vm0 = vcmask 261120   ;;  %v24_v1 = vld [vmem:[#allocation2 + $0x8] sm:$0xff]  ;;  %s120_s0 = smov [#allocation5]  }
  0x14   :  { %v25_v2 = vmul.f32 %v23_v0, %v23_v0  ;;  %v26_v3 = vmul.f32 %v24_v1, %v24_v1  ;;  %s49_s20 = sshll.u32 %s120_s0, 4  ;;  %s50_s20 = int_to_ptr.vmem [resolvable:$true] %s49_s20 }
  0x15   :  { %s91_s21 = scalar_lea.vmem %s50_s20, 256  ;;  %p96_p9 = scmp.lt.s32.totalorder %s50_s20, %s50_s20 }
  0x16   :  { %v28_v4 = vsel %vm27_vm0, %v25_v2, 0.0  ;;  %v31_v5 = vsel %vm27_vm0, %v26_v3, 0.0  ;;  %p92_p8 = scmp.ne.s32.totalorder %s50_s20, %s91_s21  ;;  %p97_p10 = scmp.lt.s32.totalorder %s91_s21, %s91_s21 }
  0x17   :  { %29 = vadd.xlane.f32.xlu0 %v28_v4 }
  0x18   :  { %p98_p11 = por %p97_p10, %p96_p9 }
  0x1a   :  { %p99_p12 = pnand %p98_p11, %p92_p8 }
  0x1b   :  { %32 = vadd.xlane.f32.xlu0 %v31_v5 }
  0xa4   :  { %v30_v6 = vpop.xlane.xlu0 %29 }
  0xa5   :  { %v34_v7 = vmul.f32 0.03125, %v30_v6 }
  0xa7   :  { %v36_v8 = vadd.f32 1e-05, %v34_v7 }
  0xa8   :  { %v33_v9 = vpop.xlane.xlu0 %32 }
  0xa9   :  { %65 = vrsqrt.f32 %v36_v8  ;;  %v35_v10 = vmul.f32 0.03125, %v33_v9 }
  0xab   :  { %v37_v11 = vadd.f32 1e-05, %v35_v10 }
  0xad   :  { %67 = vrsqrt.f32 %v37_v11 }
  0xb3   :  { %v66_v12 = vpop.eup %65 }
  0xb4   :  { %v40_v13 = vmul.f32 %v66_v12, %v23_v0 }
  0xb6   :  { %42 = vst.msk [vmem:[#allocation5] sm:$0xff] %vm27_vm0, %v40_v13 }
  0xb7   :  { %v68_v14 = vpop.eup %67 }
  0xb8   :  { %v41_v15 = vmul.f32 %v68_v14, %v24_v1 }
  0xba   :  { %43 = vst.msk [vmem:[#allocation5 + $0x8] sm:$0xff] %vm27_vm0, %v41_v15 }
  0xbb   :  { %102 = shalt.err (!%p99_p12)
}
  0xbc   :  { %s103_s24 = scalar_lea.hbm %s166_s1, 256 }
  0xbd   :  { %p104_p13 = scmp.ne.s32.totalorder %s166_s1, %s103_s24  ;;  %p107_p0 = scmp.lt.u32.totalorder %s103_s24, %s166_s1 }
  0xbf   :  { %p109_p1 = pnand %p107_p0, %p104_p13 }
  0xc1   :  { %112 = shalt.err (!%p109_p1)
}
  0xc2   :  { %55 = dma.vmem_to_hbm [thread:$0]  %s50_s20, 256, %s166_s1, [#allocation4], %s118_s16, %s118_s16, %s119_s17  }
  0xc3   :  { %115 = dma.done.wait [#allocation4], 256  }
  0xc4   :  { %116 = vsyncadd [#allocation4], 4294967040 }
  0xc5   :  { %59 = vsyncpa [#allocation3], 1 }
  0xc6   :  { %60 = vsyncpa [#allocation4], 1 }

</bundles_post_ra>
